<compile_context>
chip_gen: v5e
topology: v5e:2x2
jax: 0.10.0
libtpu: 0.0.40
codegen_flags: <defaults>
</compile_context>

<pallas_src>
import functools

import jax
import jax.numpy as jnp
import numpy as np
from jax import lax
from jax.experimental import pallas as pl
from jax.experimental.pallas import tpu as pltpu


# --------------------------------------------------------------- vmem sizing --

def _vmem_capacity_bytes():
    """Per-core VMEM capacity, generation-aware with safe fallbacks."""
    try:
        cap = int(pltpu.get_tpu_info().vmem_capacity_bytes)
        if cap > 0:
            return cap
    except Exception:
        pass
    try:
        kind = jax.devices()[0].device_kind.lower()
    except Exception:
        kind = ""
    if ("v5" in kind) or ("v6" in kind):
        return 128 << 20
    return 64 << 20  # conservative (v7x per-core VMEM)


def _choose_hw_tile(hw_pad, per_col_bytes, avail_bytes, requested=None):
    """Largest lane-aligned HW tile dividing hw_pad that fits the budget."""
    if (requested is not None and requested > 0 and requested % 128 == 0
            and hw_pad % requested == 0):
        return int(requested)
    max_cols = int(avail_bytes // max(per_col_bytes, 1))
    tile = min(hw_pad, max(128, max_cols))
    tile -= tile % 128
    tile = max(tile, 128)
    while hw_pad % tile != 0:      # hw_pad is a multiple of 128 -> terminates
        tile -= 128
    return tile


# ------------------------------------------------------------------ kernels --

def _fused_kernel(xs_ref, xc_ref, w0a_ref, w0b_ref, bias_ref, w1_ref, w2_ref,
                  out_ref, feat_vmem, atten_vmem, *,
                  inv_hw, hw_tile, hw_valid, compute_dtype):
    """Single-pass FFM: phase 0 = ConvBNReLU + pooled sum (+MLP on last tile),
    phase 1 = rescale the VMEM-resident feat slab and write the output."""
    p = pl.program_id(1)            # phase
    t = pl.program_id(2)            # HW tile
    num_t = pl.num_programs(2)
    col0 = pl.multiple_of(t * hw_tile, 128)

    @pl.when(p == 0)
    def _compute_phase():
        @pl.when(t == 0)
        def _init():
            atten_vmem[...] = jnp.zeros_like(atten_vmem)

        xs = xs_ref[0].astype(compute_dtype)              # (C1, hw_tile)
        xc = xc_ref[0].astype(compute_dtype)              # (C2, hw_tile)
        # 1x1 conv in (C, HW) layout; BN scale already folded into W0a/W0b.
        feat = jnp.dot(w0a_ref[...], xs, preferred_element_type=jnp.float32)
        feat = feat + jnp.dot(w0b_ref[...], xc, preferred_element_type=jnp.float32)
        feat = jnp.maximum(feat + bias_ref[...], 0.0)     # (Cout, hw_tile) f32

        feat_vmem[:, pl.ds(col0, hw_tile)] = feat.astype(feat_vmem.dtype)

        if hw_valid % hw_tile == 0:
            tile_sum = jnp.sum(feat, axis=-1, keepdims=True)
        else:  # padded HW -> exclude pad columns from the pooled mean
            col = col0 + lax.broadcasted_iota(jnp.int32, feat.shape, 1)
            tile_sum = jnp.sum(jnp.where(col < hw_valid, feat, 0.0),
                               axis=-1, keepdims=True)
        atten_vmem[...] += tile_sum                        # (Cout, 1)

        @pl.when(t == num_t - 1)
        def _finalize():
            pooled = atten_vmem[...] * inv_hw
            a1 = jnp.dot(w1_ref[...], pooled, preferred_element_type=jnp.float32)
            a1 = jnp.maximum(a1, 0.0)
            a2 = jnp.dot(w2_ref[...], a1, preferred_element_type=jnp.float32)
            # residual "+ feat" folded in as (sigmoid + 1)
            atten_vmem[...] = jax.nn.sigmoid(a2) + 1.0

    @pl.when(p == 1)
    def _rescale_phase():
        f = feat_vmem[:, pl.ds(col0, hw_tile)].astype(jnp.float32)
        out_ref[0] = (f * atten_vmem[...]).astype(out_ref.dtype)


def _convbn_pool_kernel(xs_ref, xc_ref, w0a_ref, w0b_ref, bias_ref, w1_ref,
                        w2_ref, feat_ref, atten_ref, *,
                        inv_hw, hw_tile, hw_valid, compute_dtype):
    """Two-pass fallback, pass 1: ConvBNReLU + pooled sum (+MLP on last tile)."""
    t = pl.program_id(1)
    num_t = pl.num_programs(1)

    xs = xs_ref[0].astype(compute_dtype)
    xc = xc_ref[0].astype(compute_dtype)
    feat = jnp.dot(w0a_ref[...], xs, preferred_element_type=jnp.float32)
    feat = feat + jnp.dot(w0b_ref[...], xc, preferred_element_type=jnp.float32)
    feat = jnp.maximum(feat + bias_ref[...], 0.0)
    feat_ref[0] = feat.astype(feat_ref.dtype)

    @pl.when(t == 0)
    def _init():
        atten_ref[...] = jnp.zeros_like(atten_ref)

    if hw_valid % hw_tile == 0:
        tile_sum = jnp.sum(feat, axis=-1, keepdims=True)
    else:
        col = t * hw_tile + lax.broadcasted_iota(jnp.int32, feat.shape, 1)
        tile_sum = jnp.sum(jnp.where(col < hw_valid, feat, 0.0),
                           axis=-1, keepdims=True)
    atten_ref[0] += tile_sum

    @pl.when(t == num_t - 1)
    def _finalize():
        pooled = atten_ref[0] * inv_hw
        a1 = jnp.maximum(jnp.dot(w1_ref[...], pooled,
                                 preferred_element_type=jnp.float32), 0.0)
        a2 = jnp.dot(w2_ref[...], a1, preferred_element_type=jnp.float32)
        atten_ref[0] = jax.nn.sigmoid(a2) + 1.0


def _rescale_kernel(feat_ref, atten_ref, out_ref):
    """Two-pass fallback, pass 2: out = feat * atten  (atten = sigmoid + 1)."""
    f = feat_ref[0].astype(jnp.float32)
    out_ref[0] = (f * atten_ref[0]).astype(out_ref.dtype)


# ------------------------------------------------------------------ wrapper --

def feature_fusion_module(fsp, fcp, params, *, hw_tile=None,
                          compute_dtype=jnp.bfloat16,
                          feat_dtype=jnp.bfloat16,
                          out_dtype=None,
                          force_two_pass=False):
    """fsp, fcp: NCHW arrays. Returns the NCHW output (N, Cout, H, W)."""
    w0, gamma, beta, run_mean, run_var, w1, w2 = params
    N, C1, H, W = fsp.shape
    C2 = fcp.shape[1]
    Cin = C1 + C2
    Cout = w0.shape[0]
    Cmid = w1.shape[0]
    HW = H * W
    eps = 1e-5
    out_dtype = fsp.dtype if out_dtype is None else out_dtype

    # ---- fold eval-mode BatchNorm into the 1x1 conv: scale -> W0, bias -----
    scale = gamma / jnp.sqrt(run_var + eps)                     # (Cout,)
    w0_folded = (w0 * scale[:, None]).astype(compute_dtype)     # (Cout, Cin)
    bias = (beta - run_mean * scale).astype(jnp.float32).reshape(Cout, 1)
    # Split W0 along input channels so torch.cat is never materialized.
    w0a = w0_folded[:, :C1]                                     # (Cout, C1)
    w0b = w0_folded[:, C1:]                                     # (Cout, C2)
    w1m = w1.astype(jnp.float32)                                # (Cmid, Cout)
    w2m = w2.astype(jnp.float32)                                # (Cout, Cmid)

    # NCHW -> (N, C, HW) is a pure reshape: no HBM shuffle.
    xs = fsp.reshape(N, C1, HW)
    xc = fcp.reshape(N, C2, HW)

    # Pad HW up to a lane multiple; pooled mean is masked in-kernel.
    HW_pad = ((HW + 127) // 128) * 128
    if HW_pad != HW:
        pad = HW_pad - HW
        xs = jnp.pad(xs, ((0, 0), (0, 0), (0, pad)))
        xc = jnp.pad(xc, ((0, 0), (0, 0), (0, pad)))

    act_bytes = jnp.dtype(xs.dtype).itemsize
    feat_bytes = jnp.dtype(feat_dtype).itemsize
    out_bytes = jnp.dtype(out_dtype).itemsize
    cdt_bytes = jnp.dtype(compute_dtype).itemsize

    # ---- generation-aware VMEM budget -----------------------------------
    vmem_cap = _vmem_capacity_bytes()
    vmem_limit = int(max(32 << 20, min(vmem_cap * 3 // 4, vmem_cap - (8 << 20))))
    budget = vmem_limit - (4 << 20)                       # compiler headroom
    weights_bytes = Cout * Cin * cdt_bytes + (Cmid * Cout + Cout * Cmid + Cout) * 4

    # Per-column VMEM cost (double-buffered tiles + in-kernel f32 working set).
    per_col_fused = 2 * Cin * act_bytes + 2 * Cout * out_bytes + 2 * Cout * 4
    fused_fixed = Cout * HW_pad * feat_bytes + weights_bytes + Cout * 512
    use_fused = (not force_two_pass) and (budget - fused_fixed >= per_col_fused * 128)

    common_params = dict(inv_hw=1.0 / HW, hw_valid=HW, compute_dtype=compute_dtype)

    if use_fused:
        tile = _choose_hw_tile(HW_pad, per_col_fused, budget - fused_fixed, hw_tile)
        num_t = HW_pad // tile
        grid = (N, 2, num_t)
        kernel = functools.partial(_fused_kernel, hw_tile=tile, **common_params)
        cost = pl.CostEstimate(
            flops=int(2 * N * HW_pad * Cin * Cout + 4 * N * Cout * Cmid
                      + 2 * N * HW_pad * Cout),
            transcendentals=int(N * Cout),
            bytes_accessed=int(N * HW_pad * (Cin * act_bytes + Cout * out_bytes)),
        )
        out = pl.pallas_call(
            kernel,
            out_shape=jax.ShapeDtypeStruct((N, Cout, HW_pad), out_dtype),
            grid_spec=pltpu.PrefetchScalarGridSpec(
                num_scalar_prefetch=0,
                grid=grid,
                in_specs=[
                    pl.BlockSpec((1, C1, tile), lambda n, p, t: (n, 0, t * (1 - p))),
                    pl.BlockSpec((1, C2, tile), lambda n, p, t: (n, 0, t * (1 - p))),
                    # Tiny, grid-constant weights / bias (resident in VMEM).
                    pl.BlockSpec((Cout, C1), lambda n, p, t: (0, 0)),
                    pl.BlockSpec((Cout, C2), lambda n, p, t: (0, 0)),
                    pl.BlockSpec((Cout, 1), lambda n, p, t: (0, 0)),
                    pl.BlockSpec((Cmid, Cout), lambda n, p, t: (0, 0)),
                    pl.BlockSpec((Cout, Cmid), lambda n, p, t: (0, 0)),
                ],
                out_specs=pl.BlockSpec((1, Cout, tile),
                                       lambda n, p, t: (n, 0, t * p)),
                scratch_shapes=[pltpu.VMEM((Cout, HW_pad), feat_dtype),
                                pltpu.VMEM((Cout, 1), jnp.float32)],
            ),
            compiler_params=pltpu.CompilerParams(
                dimension_semantics=("parallel", "arbitrary", "arbitrary"),
                vmem_limit_bytes=vmem_limit),
            cost_estimate=cost,
        )(xs, xc, w0a, w0b, bias, w1m, w2m)
    else:
        # -------------------- two-pass fallback (feat slab > VMEM) ----------
        per_col_p1 = 2 * Cin * act_bytes + 2 * Cout * feat_bytes + 2 * Cout * 4
        per_col_p2 = 2 * Cout * feat_bytes + 2 * Cout * out_bytes + Cout * 4
        tile = _choose_hw_tile(HW_pad, max(per_col_p1, per_col_p2),
                               budget - weights_bytes, hw_tile)
        num_t = HW_pad // tile
        grid = (N, num_t)
        kernel = functools.partial(_convbn_pool_kernel, hw_tile=tile, **common_params)
        cost1 = pl.CostEstimate(
            flops=int(2 * N * HW_pad * Cin * Cout + 4 * N * Cout * Cmid),
            transcendentals=int(N * Cout),
            bytes_accessed=int(N * HW_pad * (Cin * act_bytes + Cout * feat_bytes)),
        )
        feat, atten = pl.pallas_call(
            kernel,
            out_shape=(jax.ShapeDtypeStruct((N, Cout, HW_pad), feat_dtype),
                       jax.ShapeDtypeStruct((N, Cout, 1), jnp.float32)),
            grid_spec=pltpu.PrefetchScalarGridSpec(
                num_scalar_prefetch=0,
                grid=grid,
                in_specs=[
                    pl.BlockSpec((1, C1, tile), lambda n, t: (n, 0, t)),
                    pl.BlockSpec((1, C2, tile), lambda n, t: (n, 0, t)),
                    pl.BlockSpec((Cout, C1), lambda n, t: (0, 0)),
                    pl.BlockSpec((Cout, C2), lambda n, t: (0, 0)),
                    pl.BlockSpec((Cout, 1), lambda n, t: (0, 0)),
                    pl.BlockSpec((Cmid, Cout), lambda n, t: (0, 0)),
                    pl.BlockSpec((Cout, Cmid), lambda n, t: (0, 0)),
                ],
                out_specs=(
                    pl.BlockSpec((1, Cout, tile), lambda n, t: (n, 0, t)),
                    # Resident across the HW axis -> pooled-sum / atten accum.
                    pl.BlockSpec((1, Cout, 1), lambda n, t: (n, 0, 0)),
                ),
            ),
            compiler_params=pltpu.CompilerParams(
                dimension_semantics=("parallel", "arbitrary"),
                vmem_limit_bytes=vmem_limit),
            cost_estimate=cost1,
        )(xs, xc, w0a, w0b, bias, w1m, w2m)

        cost2 = pl.CostEstimate(
            flops=int(N * HW_pad * Cout),
            transcendentals=0,
            bytes_accessed=int(N * HW_pad * Cout * (feat_bytes + out_bytes)),
        )
        # Overwrite the feat buffer when dtypes allow (reduces peak HBM).
        alias = ({0: 0} if jnp.dtype(feat_dtype) == jnp.dtype(out_dtype) else {})
        out = pl.pallas_call(
            _rescale_kernel,
            out_shape=jax.ShapeDtypeStruct((N, Cout, HW_pad), out_dtype),
            grid_spec=pltpu.PrefetchScalarGridSpec(
                num_scalar_prefetch=0,
                grid=grid,
                in_specs=[
                    pl.BlockSpec((1, Cout, tile), lambda n, t: (n, 0, t)),
                    pl.BlockSpec((1, Cout, 1), lambda n, t: (n, 0, 0)),
                ],
                out_specs=pl.BlockSpec((1, Cout, tile), lambda n, t: (n, 0, t)),
            ),
            compiler_params=pltpu.CompilerParams(
                dimension_semantics=("parallel", "parallel"),
                vmem_limit_bytes=vmem_limit),
            cost_estimate=cost2,
            input_output_aliases=alias,
        )(feat, atten)

    if HW_pad != HW:
        out = out[:, :, :HW]
    # (N, Cout, HW) -> NCHW is again a pure reshape.
    return out.reshape(N, Cout, H, W)


# ------------------------------------------------------- params & reference --

def init_params(key, in_chan, out_chan):
    """Deterministic synthetic parameters matching the PyTorch module's shapes.

    Conv weights are stored as (out, in) matrices (1x1 kernels squeezed)."""
    k0, k1, k2, kg, kb = jax.random.split(key, 5)
    mid = out_chan // 4
    # kaiming_normal_(a=1): std = sqrt(2 / ((1 + a^2) * fan_in)) = sqrt(1/fan_in)
    w0 = jax.random.normal(k0, (out_chan, in_chan), jnp.float32) * (1.0 / in_chan) ** 0.5
    w1 = jax.random.normal(k1, (mid, out_chan), jnp.float32) * (1.0 / out_chan) ** 0.5
    w2 = jax.random.normal(k2, (out_chan, mid), jnp.float32) * (1.0 / mid) ** 0.5
    # BatchNorm parameters (eval mode): gamma, beta, running mean / var.
    gamma = 1.0 + 0.1 * jax.random.normal(kg, (out_chan,), jnp.float32)
    beta = 0.1 * jax.random.normal(kb, (out_chan,), jnp.float32)
    run_mean = jnp.zeros((out_chan,), jnp.float32)
    run_var = jnp.ones((out_chan,), jnp.float32)
    return (w0, gamma, beta, run_mean, run_var, w1, w2)


def reference(fsp, fcp, params):
    """Pure-JAX f32 reference of the PyTorch forward (eval-mode BatchNorm)."""
    w0, gamma, beta, run_mean, run_var, w1, w2 = params
    eps = 1e-5
    fcat = jnp.concatenate([fsp, fcp], axis=1)                   # (N, Cin, H, W)
    feat = jnp.einsum("oc,nchw->nohw", w0, fcat)
    scale = gamma / jnp.sqrt(run_var + eps)
    shift = beta - run_mean * scale
    feat = jnp.maximum(feat * scale[None, :, None, None]
                       + shift[None, :, None, None], 0.0)
    atten = feat.mean(axis=(2, 3))                               # (N, Cout)
    a1 = jnp.maximum(jnp.einsum("mc,nc->nm", w1, atten), 0.0)
    a2 = jax.nn.sigmoid(jnp.einsum("cm,nm->nc", w2, a1))
    return feat * (a2[:, :, None, None] + 1.0)


# --------------------------------------------------------------------- main --

if __name__ == "__main__":
    key = jax.random.PRNGKey(0)
    k_fsp, k_fcp, k_params, k_fsp2, k_fcp2 = jax.random.split(key, 5)

    # Small demo shapes: each branch has 4 channels -> in_chan=8, out_chan=8.
    N, C_branch, H, W = 2, 4, 16, 16
    in_chan = 2 * C_branch
    out_chan = 8

    fsp = jax.random.normal(k_fsp, (N, C_branch, H, W), jnp.float32)
    fcp = jax.random.normal(k_fcp, (N, C_branch, H, W), jnp.float32)
    params = init_params(k_params, in_chan, out_chan)
    ref = reference(fsp, fcp, params)

    # 1) Fused single-pass path; hw_tile=128 -> 2 HW tiles per image so the
    #    cross-tile pooled-sum accumulation is exercised.
    out = feature_fusion_module(fsp, fcp, params, hw_tile=128)
    out = jax.block_until_ready(out)
    assert out.shape == (N, out_chan, H, W), out.shape
    np.testing.assert_allclose(np.asarray(out), np.asarray(ref),
                               rtol=5e-2, atol=5e-2)

    # 2) Two-pass fallback path (taken when the per-image feat slab > VMEM).
    out2 = feature_fusion_module(fsp, fcp, params, hw_tile=128,
                                 force_two_pass=True)
    out2 = jax.block_until_ready(out2)
    np.testing.assert_allclose(np.asarray(out2), np.asarray(ref),
                               rtol=5e-2, atol=5e-2)

    # 3) Non-128-aligned spatial size: HW=100 -> padded to 128, masked pool.
    fsp3 = jax.random.normal(k_fsp2, (1, C_branch, 10, 10), jnp.float32)
    fcp3 = jax.random.normal(k_fcp2, (1, C_branch, 10, 10), jnp.float32)
    ref3 = reference(fsp3, fcp3, params)
    out3 = feature_fusion_module(fsp3, fcp3, params)
    out3 = jax.block_until_ready(out3)
    assert out3.shape == (1, out_chan, 10, 10), out3.shape
    np.testing.assert_allclose(np.asarray(out3), np.asarray(ref3),
                               rtol=5e-2, atol=5e-2)

    print("KERNEL_OK")
</pallas_src>

<mosaic_0001>
module attributes {stable_mosaic.version = 11 : i64} {
  func.func @_fused_kernel(%arg0: i32, %arg1: i32, %arg2: i32, %arg3: memref<1x4x128xf32, #tpu.memory_space<vmem>>, %arg4: memref<1x4x128xf32, #tpu.memory_space<vmem>>, %arg5: memref<8x4xbf16, #tpu.memory_space<vmem>>, %arg6: memref<8x4xbf16, #tpu.memory_space<vmem>>, %arg7: memref<8x1xf32, #tpu.memory_space<vmem>>, %arg8: memref<2x8xf32, #tpu.memory_space<vmem>>, %arg9: memref<8x2xf32, #tpu.memory_space<vmem>>, %arg10: memref<1x8x128xf32, #tpu.memory_space<vmem>>, %arg11: memref<8x256xbf16, #tpu.memory_space<vmem>>, %arg12: memref<8x1xf32, #tpu.memory_space<vmem>>) attributes {dimension_semantics = [#tpu.dimension_semantics<parallel>, #tpu.dimension_semantics<arbitrary>, #tpu.dimension_semantics<arbitrary>], iteration_bounds = array<i64: 2, 2, 2>, scalar_prefetch = 0 : i64, scratch_operands = 2 : i64, tpu.core_type = #tpu.core_type<tc>, window_params = [{transform_indices = @transform_0, window_bounds = array<i64: 1, 4, 128>}, {transform_indices = @transform_1, window_bounds = array<i64: 1, 4, 128>}, {pipeline_mode = #tpu.pipeline_mode<synchronous>, transform_indices = @transform_2, window_bounds = array<i64: 8, 4>}, {pipeline_mode = #tpu.pipeline_mode<synchronous>, transform_indices = @transform_3, window_bounds = array<i64: 8, 4>}, {pipeline_mode = #tpu.pipeline_mode<synchronous>, transform_indices = @transform_4, window_bounds = array<i64: 8, 1>}, {pipeline_mode = #tpu.pipeline_mode<synchronous>, transform_indices = @transform_5, window_bounds = array<i64: 2, 8>}, {pipeline_mode = #tpu.pipeline_mode<synchronous>, transform_indices = @transform_6, window_bounds = array<i64: 8, 2>}, {transform_indices = @transform_7, window_bounds = array<i64: 1, 8, 128>}]} {
    %c128_i32 = arith.constant 128 : i32
    %0 = arith.muli %arg2, %c128_i32 : i32
    %1 = tpu.assume_multiple %0, 128 : i32
    %c0_i32 = arith.constant 0 : i32
    %2 = arith.cmpi eq, %arg1, %c0_i32 : i32
    %3 = arith.extui %2 : i1 to i32
    %c0_i32_0 = arith.constant 0 : i32
    %4 = arith.cmpi ne, %3, %c0_i32_0 : i32
    scf.if %4 {
      %c0_i32_2 = arith.constant 0 : i32
      %8 = arith.cmpi eq, %arg2, %c0_i32_2 : i32
      %9 = arith.extui %8 : i1 to i32
      %c0_i32_3 = arith.constant 0 : i32
      %10 = arith.cmpi ne, %9, %c0_i32_3 : i32
      scf.if %10 {
        %cst_25 = arith.constant 0.000000e+00 : f32
        %38 = vector.broadcast %cst_25 : f32 to vector<8x1xf32>
        %c0_26 = arith.constant 0 : index
        %c0_27 = arith.constant 0 : index
        %39 = vector.load %arg12[%c0_26, %c0_27] : memref<8x1xf32, #tpu.memory_space<vmem>>, vector<8x1xf32>
        tpu.vector_store %arg12[%c0_26, %c0_27], %38 {strides = array<i32>} : memref<8x1xf32, #tpu.memory_space<vmem>>, vector<8x1xf32>,
      } else {
      }
      %c0 = arith.constant 0 : index
      %c0_4 = arith.constant 0 : index
      %c0_5 = arith.constant 0 : index
      %11 = vector.load %arg3[%c0, %c0_4, %c0_5] : memref<1x4x128xf32, #tpu.memory_space<vmem>>, vector<1x4x128xf32>
      %12 = vector.shape_cast %11 : vector<1x4x128xf32> to vector<4x128xf32>
      %13 = arith.truncf %12 : vector<4x128xf32> to vector<4x128xbf16>
      %c0_6 = arith.constant 0 : index
      %c0_7 = arith.constant 0 : index
      %c0_8 = arith.constant 0 : index
      %14 = vector.load %arg4[%c0_6, %c0_7, %c0_8] : memref<1x4x128xf32, #tpu.memory_space<vmem>>, vector<1x4x128xf32>
      %15 = vector.shape_cast %14 : vector<1x4x128xf32> to vector<4x128xf32>
      %16 = arith.truncf %15 : vector<4x128xf32> to vector<4x128xbf16>
      %c0_9 = arith.constant 0 : index
      %c0_10 = arith.constant 0 : index
      %17 = vector.load %arg5[%c0_9, %c0_10] : memref<8x4xbf16, #tpu.memory_space<vmem>>, vector<8x4xbf16>
      %cst = arith.constant dense<0.000000e+00> : vector<8x128xf32>
      %18 = tpu.matmul %17, %13, %cst {dimension_numbers = #tpu.dot_dimension_numbers<[1], [0], [0], [1], [0, 0, 1, 1], [], []>} : vector<8x4xbf16>, vector<4x128xbf16>, vector<8x128xf32> -> vector<8x128xf32>
      %c0_11 = arith.constant 0 : index
      %c0_12 = arith.constant 0 : index
      %19 = vector.load %arg6[%c0_11, %c0_12] : memref<8x4xbf16, #tpu.memory_space<vmem>>, vector<8x4xbf16>
      %cst_13 = arith.constant dense<0.000000e+00> : vector<8x128xf32>
      %20 = tpu.matmul %19, %16, %cst_13 {dimension_numbers = #tpu.dot_dimension_numbers<[1], [0], [0], [1], [0, 0, 1, 1], [], []>} : vector<8x4xbf16>, vector<4x128xbf16>, vector<8x128xf32> -> vector<8x128xf32>
      %21 = arith.addf %18, %20 : vector<8x128xf32>
      %c0_14 = arith.constant 0 : index
      %c0_15 = arith.constant 0 : index
      %22 = vector.load %arg7[%c0_14, %c0_15] : memref<8x1xf32, #tpu.memory_space<vmem>>, vector<8x1xf32>
      %23 = vector.broadcast %22 : vector<8x1xf32> to vector<8x128xf32>
      %24 = arith.addf %21, %23 : vector<8x128xf32>
      %cst_16 = arith.constant 0.000000e+00 : f32
      %25 = vector.broadcast %cst_16 : f32 to vector<8x128xf32>
      %26 = arith.maximumf %24, %25 : vector<8x128xf32>
      %27 = arith.truncf %26 : vector<8x128xf32> to vector<8x128xbf16>
      %c0_17 = arith.constant 0 : index
      %28 = arith.index_cast %1 : i32 to index
      %29 = vector.load %arg11[%c0_17, %28] : memref<8x256xbf16, #tpu.memory_space<vmem>>, vector<8x128xbf16>
      tpu.vector_store %arg11[%c0_17, %28], %27 {strides = array<i32>} : memref<8x256xbf16, #tpu.memory_space<vmem>>, vector<8x128xbf16>,
      %cst_18 = arith.constant dense<0.000000e+00> : vector<8xf32>
      %30 = vector.multi_reduction <add>, %26, %cst_18 [1] : vector<8x128xf32> to vector<8xf32>
      %31 = vector.shape_cast %30 : vector<8xf32> to vector<8x1xf32>
      %c0_19 = arith.constant 0 : index
      %c0_20 = arith.constant 0 : index
      %32 = vector.load %arg12[%c0_19, %c0_20] : memref<8x1xf32, #tpu.memory_space<vmem>>, vector<8x1xf32>
      %33 = arith.addf %32, %31 : vector<8x1xf32>
      %c0_21 = arith.constant 0 : index
      %c0_22 = arith.constant 0 : index
      %34 = vector.load %arg12[%c0_21, %c0_22] : memref<8x1xf32, #tpu.memory_space<vmem>>, vector<8x1xf32>
      tpu.vector_store %arg12[%c0_21, %c0_22], %33 {strides = array<i32>} : memref<8x1xf32, #tpu.memory_space<vmem>>, vector<8x1xf32>,
      %c1_i32_23 = arith.constant 1 : i32
      %35 = arith.cmpi eq, %arg2, %c1_i32_23 : i32
      %36 = arith.extui %35 : i1 to i32
      %c0_i32_24 = arith.constant 0 : i32
      %37 = arith.cmpi ne, %36, %c0_i32_24 : i32
      scf.if %37 {
        %c0_25 = arith.constant 0 : index
        %c0_26 = arith.constant 0 : index
        %38 = vector.load %arg12[%c0_25, %c0_26] : memref<8x1xf32, #tpu.memory_space<vmem>>, vector<8x1xf32>
        %cst_27 = arith.constant 3.906250e-03 : f32
        %39 = vector.broadcast %cst_27 : f32 to vector<8x1xf32>
        %40 = arith.mulf %38, %39 : vector<8x1xf32>
        %c0_28 = arith.constant 0 : index
        %c0_29 = arith.constant 0 : index
        %41 = vector.load %arg8[%c0_28, %c0_29] : memref<2x8xf32, #tpu.memory_space<vmem>>, vector<2x8xf32>
        %cst_30 = arith.constant dense<0.000000e+00> : vector<2x1xf32>
        %42 = tpu.matmul %41, %40, %cst_30 {dimension_numbers = #tpu.dot_dimension_numbers<[1], [0], [0], [1], [0, 0, 1, 1], [], []>} : vector<2x8xf32>, vector<8x1xf32>, vector<2x1xf32> -> vector<2x1xf32>
        %cst_31 = arith.constant 0.000000e+00 : f32
        %43 = vector.broadcast %cst_31 : f32 to vector<2x1xf32>
        %44 = arith.maximumf %42, %43 : vector<2x1xf32>
        %c0_32 = arith.constant 0 : index
        %c0_33 = arith.constant 0 : index
        %45 = vector.load %arg9[%c0_32, %c0_33] : memref<8x2xf32, #tpu.memory_space<vmem>>, vector<8x2xf32>
        %cst_34 = arith.constant dense<0.000000e+00> : vector<8x1xf32>
        %46 = tpu.matmul %45, %44, %cst_34 {dimension_numbers = #tpu.dot_dimension_numbers<[1], [0], [0], [1], [0, 0, 1, 1], [], []>} : vector<8x2xf32>, vector<2x1xf32>, vector<8x1xf32> -> vector<8x1xf32>
        %47 = arith.negf %46 : vector<8x1xf32>
        %48 = math.exp %47 : vector<8x1xf32>
        %cst_35 = arith.constant 1.000000e+00 : f32
        %49 = vector.broadcast %cst_35 : f32 to vector<8x1xf32>
        %50 = arith.addf %49, %48 : vector<8x1xf32>
        %51 = arith.divf %49, %50 : vector<8x1xf32>
        %cst_36 = arith.constant 1.000000e+00 : f32
        %52 = vector.broadcast %cst_36 : f32 to vector<8x1xf32>
        %53 = arith.addf %51, %52 : vector<8x1xf32>
        %c0_37 = arith.constant 0 : index
        %c0_38 = arith.constant 0 : index
        %54 = vector.load %arg12[%c0_37, %c0_38] : memref<8x1xf32, #tpu.memory_space<vmem>>, vector<8x1xf32>
        tpu.vector_store %arg12[%c0_37, %c0_38], %53 {strides = array<i32>} : memref<8x1xf32, #tpu.memory_space<vmem>>, vector<8x1xf32>,
      } else {
      }
    } else {
    }
    %c1_i32 = arith.constant 1 : i32
    %5 = arith.cmpi eq, %arg1, %c1_i32 : i32
    %6 = arith.extui %5 : i1 to i32
    %c0_i32_1 = arith.constant 0 : i32
    %7 = arith.cmpi ne, %6, %c0_i32_1 : i32
    scf.if %7 {
      %c0 = arith.constant 0 : index
      %8 = arith.index_cast %1 : i32 to index
      %9 = vector.load %arg11[%c0, %8] : memref<8x256xbf16, #tpu.memory_space<vmem>>, vector<8x128xbf16>
      %10 = arith.extf %9 : vector<8x128xbf16> to vector<8x128xf32>
      %c0_2 = arith.constant 0 : index
      %c0_3 = arith.constant 0 : index
      %11 = vector.load %arg12[%c0_2, %c0_3] : memref<8x1xf32, #tpu.memory_space<vmem>>, vector<8x1xf32>
      %12 = vector.broadcast %11 : vector<8x1xf32> to vector<8x128xf32>
      %13 = arith.mulf %10, %12 : vector<8x128xf32>
      %c0_4 = arith.constant 0 : index
      %c0_5 = arith.constant 0 : index
      %c0_6 = arith.constant 0 : index
      %14 = vector.load %arg10[%c0_4, %c0_5, %c0_6] : memref<1x8x128xf32, #tpu.memory_space<vmem>>, vector<1x8x128xf32>
      %15 = vector.shape_cast %14 : vector<1x8x128xf32> to vector<8x128xf32>
      %16 = vector.shape_cast %13 : vector<8x128xf32> to vector<1x8x128xf32>
      tpu.vector_store %arg10[%c0_4, %c0_5, %c0_6], %16 {strides = array<i32>} : memref<1x8x128xf32, #tpu.memory_space<vmem>>, vector<1x8x128xf32>,
    } else {
    }
    return
  }
  func.func @transform_0(%arg0: i32, %arg1: i32, %arg2: i32) -> (i32, i32, i32) {
    %c1_i32 = arith.constant 1 : i32
    %0 = arith.subi %c1_i32, %arg1 : i32
    %1 = arith.muli %arg2, %0 : i32
    %c0_i32 = arith.constant 0 : i32
    %c0_i32_0 = arith.constant 0 : i32
    return %arg0, %c0_i32, %1 : i32, i32, i32
  }
  func.func @transform_1(%arg0: i32, %arg1: i32, %arg2: i32) -> (i32, i32, i32) {
    %c1_i32 = arith.constant 1 : i32
    %0 = arith.subi %c1_i32, %arg1 : i32
    %1 = arith.muli %arg2, %0 : i32
    %c0_i32 = arith.constant 0 : i32
    %c0_i32_0 = arith.constant 0 : i32
    return %arg0, %c0_i32, %1 : i32, i32, i32
  }
  func.func @transform_2(%arg0: i32, %arg1: i32, %arg2: i32) -> (i32, i32) {
    %c0_i32 = arith.constant 0 : i32
    %c0_i32_0 = arith.constant 0 : i32
    %c0_i32_1 = arith.constant 0 : i32
    return %c0_i32, %c0_i32_0 : i32, i32
  }
  func.func @transform_3(%arg0: i32, %arg1: i32, %arg2: i32) -> (i32, i32) {
    %c0_i32 = arith.constant 0 : i32
    %c0_i32_0 = arith.constant 0 : i32
    %c0_i32_1 = arith.constant 0 : i32
    return %c0_i32, %c0_i32_0 : i32, i32
  }
  func.func @transform_4(%arg0: i32, %arg1: i32, %arg2: i32) -> (i32, i32) {
    %c0_i32 = arith.constant 0 : i32
    %c0_i32_0 = arith.constant 0 : i32
    %c0_i32_1 = arith.constant 0 : i32
    return %c0_i32, %c0_i32_0 : i32, i32
  }
  func.func @transform_5(%arg0: i32, %arg1: i32, %arg2: i32) -> (i32, i32) {
    %c0_i32 = arith.constant 0 : i32
    %c0_i32_0 = arith.constant 0 : i32
    %c0_i32_1 = arith.constant 0 : i32
    return %c0_i32, %c0_i32_0 : i32, i32
  }
  func.func @transform_6(%arg0: i32, %arg1: i32, %arg2: i32) -> (i32, i32) {
    %c0_i32 = arith.constant 0 : i32
    %c0_i32_0 = arith.constant 0 : i32
    %c0_i32_1 = arith.constant 0 : i32
    return %c0_i32, %c0_i32_0 : i32, i32
  }
  func.func @transform_7(%arg0: i32, %arg1: i32, %arg2: i32) -> (i32, i32, i32) {
    %0 = arith.muli %arg2, %arg1 : i32
    %c0_i32 = arith.constant 0 : i32
    %c0_i32_0 = arith.constant 0 : i32
    return %arg0, %c0_i32, %0 : i32, i32, i32
  }
}

</mosaic_0001>

<bundles_post_ra>
// kernel: tpu_custom_call.1
= control target key start
LH: loop header
LB: loop body
LE: loop exit
PB: predicated region body
PF: predicated region fallthrough
CT: control target
= control target key end

     0   :  { %s1315_s0 = inlined_call_operand.vmem [shape: f32[2,4,256], index: 0, kind: input, shape index: {}]   ;;  %s1316_s1 = inlined_call_operand.hbm [shape: f32[2,4,256], index: 1, kind: input, shape index: {}]   ;;  %s1317_s2 = inlined_call_operand.vmem [shape: bf16[8,4], index: 2, kind: input, shape index: {}]   ;;  %s1318_s3 = inlined_call_operand.vmem [shape: bf16[8,4], index: 3, kind: input, shape index: {}]   ;;  %s1319_s4 = inlined_call_operand.vmem [shape: f32[8,1], index: 4, kind: input, shape index: {}]   ;;  %s1320_s5 = inlined_call_operand.vmem [shape: f32[2,8], index: 5, kind: input, shape index: {}]   ;;  %s1321_s6 = inlined_call_operand.vmem [shape: f32[8,2], index: 6, kind: input, shape index: {}]   ;;  %s1322_s7 = inlined_call_operand.hbm [shape: f32[2,8,256], index: 7, kind: output, shape index: {}]  }
   0x1   :  { %1330 = sst [smem:[#allocation15_spill]] %s1315_s0 }
   0x2   :  { %1331 = sst [smem:[#allocation16_spill]] %s1316_s1 }
   0x3   :  { %1332 = sst [smem:[#allocation17_spill]] %s1317_s2 }
   0x4   :  { %1333 = sst [smem:[#allocation18_spill]] %s1318_s3 }
   0x5   :  { %1334 = sst [smem:[#allocation19_spill]] %s1319_s4 }
   0x6   :  { %1335 = sst [smem:[#allocation20_spill]] %s1320_s5 }
   0x7   :  { %1336 = sst [smem:[#allocation21_spill]] %s1321_s6 }
   0x8   :  { %1337 = sst [smem:[#allocation22_spill]] %s1322_s7 }
   0x9   :  { %12 = vsyncpa [#allocation5], 0 }
   0xa   :  { %14 = vsyncpa [#allocation5 + $0x1], 0 }
   0xb   :  { %15 = vsyncpa [#allocation6], 0 }
   0xc   :  { %17 = vsyncpa [#allocation6 + $0x1], 0  ;;  %s1056_s24 = smov 0   ;;  %s1058_s25 = smov 0  }
   0xd   :  { %s1060_s26 = smov 0   ;;  %s1062_s27 = smov 0  }
   0xe   :  { %s1064_s28 = smov 0   ;;  %s1066_s29 = smov 0  }
   0xf   :  { %s1068_s30 = smov 0   ;;  %s1070_s8 = smov 0  }
  0x10   :  { %s1072_s9 = smov 0   ;;  %s1074_s10 = smov 0  }
  0x11   :  { %s1076_s11 = smov 0   ;;  %s1078_s12 = smov 0  }
  0x12   :  { %s1080_s13 = smov 0  }
  0x13 LB: > { %1338 = sst [smem:[#allocation10_spill]] %s999_s10  ;;  %s1323_s14 = sadd.s32 4294967295, %s1011_s13   ;;  %s1011_s13 = sphi %s1080_s13, %s23_s13   ;;  %s1007_s12 = sphi %s1078_s12, %s1372_s12   ;;  %s1003_s11 = sphi %s1076_s11, %s1371_s11   ;;  %s999_s10 = sphi %s1074_s10, %s1361_s10   ;;  %s995_s9 = sphi %s1072_s9, %s1370_s9   ;;  %s991_s8 = sphi %s1070_s8, %s1360_s8   ;;  %s987_s30 = sphi %s1068_s30, %s1359_s30   ;;  %s983_s29 = sphi %s1066_s29, %s1369_s29   ;;  %s979_s28 = sphi %s1064_s28, %s1368_s28   ;;  %s975_s27 = sphi %s1062_s27, %s1367_s27   ;;  %s971_s26 = sphi %s1060_s26, %s1366_s26   ;;  %s967_s25 = sphi %s1058_s25, %s1365_s25   ;;  %s963_s24 = sphi %s1056_s24, %s1364_s24  }
  0x14   : > { %1339 = sst [smem:[#allocation11_spill]] %s1003_s11  ;;  %s35_s16 = sadd.s32 1, %s999_s10 }
  0x15   : > { %s38_s17 = sadd.s32 1, %s1003_s11  ;;  %p36_p0 = scmp.ge.s32.totalorder %s35_s16, 2 }
  0x16   : > { %s42_s18 = sadd.s32 1, %s1007_s12  ;;  %s78_s19 = ssub.s32 1, %s1003_s11 }
  0x17   : > { %s87_s20 = sadd.s32 1, %s983_s29  ;;  %s1374_s16 = smov (%p36_p0, %s35_s16), 0 }
  0x18   : > { %1340 = sst [smem:[#allocation12_spill]] %s1374_s16  ;;  %s1376_s17 = smov (!%p36_p0, %s38_s17), %s1003_s11 }
  0x19   : > { %s1132_s21 = smul.u32 %s999_s10, %s78_s19  ;;  %p94_p1 = scmp.ne.s32.totalorder %s983_s29, %s979_s28 }
  0x1a   : > { %p40_p2 = scmp.ge.s32.totalorder %s1376_s17, 2  ;;  %p95_p3 = scmp.eq.s32.totalorder %s1011_s13, 0 }
  0x1b   : > { %p100_p4 = scmp.ne.s32.totalorder %s979_s28, %s975_s27  ;;  %p101_p5 = scmp.eq.s32.totalorder %s1323_s14, 0 }
  0x1c   : > { %s1378_s17 = smov (%p40_p2, %s1376_s17), 0  ;;  %s1380_s18 = smov (!%p40_p2, %s42_s18), %s1007_s12 }
  0x1d   : > { %1341 = sst [smem:[#allocation13_spill]] %s1378_s17  ;;  %s80_s22 = ssub.s32 1, %s1378_s17 }
  0x1e   : > { %p1145_p6 = por %p95_p3, %p94_p1  ;;  %p44_p7 = scmp.ge.s32.totalorder %s1380_s18, 2 }
  0x1f   : > { %s81_s19 = smul.u32 %s80_s22, %s1374_s16  ;;  %p1150_p8 = por %p101_p5, %p100_p4 }
  0x20   : > { %s215_s15 = smul.u32 %s999_s10, %s1003_s11  ;;  %s1382_s18 = smov (%p44_p7, %s1380_s18), 0 }
  0x21   : > { %1344 = sst [smem:[#allocation14_spill]] %s1382_s18  ;;  %s83_s14 = ssub.s32 %s1132_s21, %s81_s19 }
  0x22   : > { %s216_s7 = smul.u32 %s1378_s17, %s1374_s16  ;;  %s82_s6 = ssub.s32 %s1007_s12, %s1382_s18 }
  0x23   : > { %s222_s5 = sadd.s32 1, %s971_s26  ;;  %s84_s2 = sor.u32 %s83_s14, %s82_s6 }
  0x24   : > { %s218_s22 = ssub.s32 %s215_s15, %s216_s7  ;;  %p85_p9 = scmp.eq.s32.totalorder %s84_s2, 0 }
  0x25   : > { %s219_s3 = sor.u32 %s218_s22, %s82_s6  ;;  %p232_p11 = scmp.ne.s32.totalorder %s971_s26, %s967_s25 }
  0x26   : > { %p220_p10 = scmp.eq.s32.totalorder %s219_s3, 0  ;;  %s1345_s10 = sadd.s32 4294967295, %s1011_s13  }
  0x27   : > { %s1167_s4 = scalar_select %p85_p9, %s983_s29, %s87_s20  }
  0x28   : > { %s1170_s11 = scalar_select %p220_p10, %s971_s26, %s222_s5  }
  0x29   : > { %p233_p12 = scmp.eq.s32.totalorder %s1345_s10, 7  ;;  %p238_p13 = scmp.ne.s32.totalorder %s967_s25, %s963_s24 }
  0x2a   : > { %s1346_s19 = sadd.s32 4294967294, %s1011_s13   ;;  %p728_p2 = scmp.lt.s32.totalorder %s1011_s13, 8 }
  0x2b   : > { %p239_p0 = scmp.eq.s32.totalorder %s1346_s19, 7  ;;  %p1178_p1 = por %p233_p12, %p232_p11 }
  0x2c   : > { %s289_s3 = sand.u32 1, %s983_s29   ;;  %s691_s6 = sshll.u32 %s1007_s12, 1 }
  0x2d   : > { %p1183_p3 = por %p239_p0, %p238_p13  ;;  %s690_s5 = sshll.u32 %s289_s3, 2 }
  0x2e   : > { %s299_s7 = sadd.s32 %s691_s6, %s1132_s21  ;;  %s293_s15 = scalar_lea.vmem [#allocation4], %s690_s5 }
  0x2f   : > { %s305_s10 = sshll.u32 %s293_s15, 4  ;;  %s692_s20 = sshll.u32 %s299_s7, 2  ;;  %s306_s10 = int_to_ptr.vmem [resolvable:$true] %s305_s10 }
  0x30   : > { %s1349_s1 = sld [smem:[#allocation16_spill]]  ;;  %p721_p4 = pnand %p728_p2, %p1145_p6 }
  0x31   : > { %p693_p5 = scmp.ge.s32.totalorder %s1011_s13, 1  ;;  %s290_s16 = scalar_lea.sflag [#allocation5], %s289_s3 }
  0x32   : > { %p310_p7 = scmp.lt.s32.totalorder %s1011_s13, 9 }
  0x34   : > { %p311_p9 = pnand %p693_p5, %p310_p7 }
  0x35   : > { %s316_s21 = sand.u32 (!%p311_p9), 1, %s979_s28  }
  0x36   : > { %s301_s18 = scalar_lea.hbm %s1349_s1, %s692_s20  ;;  %314 = sbr.rel (%p311_p9) target bundleno = 784 (0x310), region = 48 }
  0x37   : > { %s303_s17 = sshll.u32 %s301_s18, 4  ;;  %s694_s5 = sshll.u32 (!%p311_p9), %s316_s21, 2  ;;  %s304_s17 = int_to_ptr.hbm [resolvable:$true] %s303_s17 }
  0x38   : > { %723 = dma.hbm_to_vmem [thread:$0]  (!%p721_p4), %s304_s17, 64, %s306_s10, %s290_s16  }
  0x39   : > { %s317_s6 = scalar_lea.sflag (!%p311_p9), [#allocation5], %s316_s21  ;;  %s320_s7 = scalar_lea.vmem (!%p311_p9), [#allocation4], %s694_s5 }
  0x3b   : > { %954 = dma.done.wait (%p1150_p8), %s317_s6, 64  }
  0x3c   : > { %956 = vsyncadd (%p1150_p8), %s317_s6, 4294967232  ;;  %s359_s16 = sand.u32 1, %s967_s25   ;;  %s362_s17 = ssub.s32 1, %s991_s8 }
  0x3d   : > { %s1206_s18 = sshll.u32 %s359_s16, 3  ;;  %s363_s23 = smul.u32 %s987_s30, %s362_s17 }
  0x3e   : > { %p364_p6 = scmp.lt.s32.totalorder %s995_s9, 1  ;;  %s698_s3 = sshll.u32 %s987_s30, 7 }
  0x3f   : > { %p366_p10 = scmp.lt.s32.totalorder %s363_s23, 1  ;;  %s1350_s0 = sld [smem:[#allocation15_spill]] }
  0x40   : > { %s365_s15 = scalar_select %p364_p6, %s995_s9, 1 }
  0x41   : > { %s1384_s23 = smov (!%p366_p10, %s363_s23), 1  ;;  %s361_s5 = scalar_lea.vmem [#allocation7], %s1206_s18 }
  0x42   : > { %s696_s27 = sshll.u32 %s365_s15, 1  ;;  %p699_p8 = scmp.ne.s32.totalorder %s991_s8, 0 }
  0x43   : > { %s369_s10 = sadd.s32 %s696_s27, %s1384_s23  ;;  %p700_p11 = scmp.ne.s32.totalorder (!%p699_p8), %s987_s30, 0 }
  0x44   : > { %s697_s20 = sshll.u32 %s369_s10, 2  ;;  %382 = sbr.rel (%p699_p8) target bundleno = 636 (0x27c), region = 56 }
  0x45   : > { %s371_s21 = scalar_lea.vmem %s1350_s0, %s697_s20 }
  0x49   : > { %386 = sbr.rel (%p700_p11) target bundleno = 80 (0x50), region = 60 }
  0x4e   : > { %vm387_vm0 = vcmask 7168   ;;  %v1013_v0 = vmov 0.0  }
  0x4f   : > { %388 = vst.msk [vmem:[#allocation3] sm:$0xff] %vm387_vm0, %v1013_v0 }
  0x50 PF: > { %v391_v1 = vld [vmem:[%s320_s7] sm:$0xf]  ;;  %vm399_vm1 = vcmask 1041408   ;;  %v389_v2 = vld [vmem:[%s371_s21] sm:$0xf]  ;;  %s1351_s23 = sld [smem:[#allocation19_spill]] }
  0x51   : > { %v392_v3 = vpack.c.bf16 %v391_v1, %v391_v1  ;;  %v390_v4 = vpack.c.bf16 %v389_v2, %v389_v2  ;;  %v1014_v6 = vmov 0   ;;  %s1352_s27 = sld [smem:[#allocation18_spill]]  ;;  %vm395_vm2 = vcmask 31744   ;;  %s444_s19 = sshra.s32 %s698_s3, 7 }
  0x52   : > { %837 = vset.pattern.permute.xlu0 %v1014_v6  ;;  %s1353_s22 = sld [smem:[#allocation17_spill]]  ;;  %s703_s21 = sshll.u32 %s444_s19, 2  ;;  %vm453_vm3 = vcmask 7168  }
  0x53   : > { %v401_v7 = vsel %vm399_vm1, %v392_v3, 0  ;;  %v420_v8 = vsel %vm399_vm1, %v390_v4, 0  ;;  %s447_s6 = scalar_lea.vmem [#allocation2], %s703_s21  ;;  %p704_p12 = scmp.ne.s32.totalorder %s987_s30, 1 }
  0x54   : > { %410 = vmatpush.bf16.msra.mxu0 %v401_v7  ;;  %429 = vmatpush.bf16.msra.mxu1 %v420_v8  ;;  %s1354_s15 = sld [smem:[#allocation20_spill]] (!%p704_p12) }
  0x55   : > { %s1355_s10 = sld [smem:[#allocation21_spill]] (!%p704_p12) }
  0x56   : > { %v435_v5 = vld [vmem:[%s1351_s23] sm:$0xff]  ;;  %v451_v20 = vld [vmem:[#allocation3] sm:$0xff] }
  0x57   : > { %438 = vperm.xlu0 %837, %v435_v5   ;;  %v394_v9 = vld [vmem:[%s1352_s27] sm:$0xf] }
  0x58   : > { %v393_v10 = vld [vmem:[%s1353_s22] sm:$0xf]  ;;  %701 = vmatmul.msk.bf16.vlgmr.msra.gmra.mxu0 %vm395_vm2, %v394_v9 }
  0x59   : > { %702 = vmatmul.msk.bf16.vlgmr.msra.gmra.mxu1 %vm395_vm2, %v393_v10 }
  0xc9   : > { %v439_v11 = vpop.permute.xlu0 %438 }
  0xd5   : > { %v412_v12 = vpop.f32.mrf.mxu0 }
  0xd6   : > { %v431_v13 = vpop.f32.mrf.mxu1 }
  0xd7   : > { %v432_v14 = vadd.f32 %v431_v13, %v412_v12 }
  0xd9   : > { %v441_v15 = vadd.f32 %v439_v11, %v432_v14 }
  0xdb   : > { %v442_v16 = vmax.f32 %v441_v15, 0.0 }
  0xdd   : > { %v443_v17 = vpack.c.bf16 %v442_v16, %v442_v16  ;;  %449 = vadd.xlane.f32.xlu0 %v442_v16  ;;  %v414_v18 = vpop.f32.mrf.mxu0 }
  0xde   : > { %v433_v19 = vpop.f32.mrf.mxu1 }
  0xdf   : > { %448 = vst [vmem:[%s447_s6] sm:$0xf] %v443_v17 }
 0x14f   : > { %458 = sbr.rel (%p704_p12) target bundleno = 636 (0x27c), region = 64 }
 0x150   : > { %v450_v21 = vpop.xlane.xlu0 %449 }
 0x151   : > { %v452_v22 = vadd.f32 %v451_v20, %v450_v21 }
 0x153   : > { %454 = vst.msk [vmem:[#allocation3] sm:$0xff] %vm453_vm3, %v452_v22 }
 0x154   : > { %v461_v25 = vld [vmem:[%s1354_s15] sm:$0x3]  ;;  %vm462_vm4 = vcmask 64512   ;;  %vm488_vm5 = vcmask 15360  }
 0x155   : > { %v487_v28 = vld [vmem:[%s1355_s10] sm:$0xff] }
 0x15a   : > { %v459_v23 = vld [vmem:[#allocation3] sm:$0xff] }
 0x15b   : > { %v460_v24 = vmul.f32 0.00390625, %v459_v23 }
 0x15d   : > { %481 = vmatpush.msra.mxu0 %v460_v24 }
 0x15e   : > { %705 = vmatmul.msk.f32.vlgmr.msra.gmra.mxu0 %vm462_vm4, %v461_v25 }
 0x1db   : > { %v483_v26 = vpop.f32.mrf.mxu0 }
 0x1dc   : > { %v486_v27 = vmax.f32 %v483_v26, 0.0 }
 0x1de   : > { %706 = vmatpush.msk.msra.mxu1 %vm399_vm1, %v486_v27 }
 0x1df   : > { %707 = vmatmul.msk.f32.vlgmr.msra.gmra.mxu1 %vm488_vm5, %v487_v28 }
 0x25c   : > { %v512_v29 = vpop.f32.mrf.mxu1 }
 0x25d   : > { %v708_v30 = vmul.f32 -1.442695, %v512_v29 }
 0x25f   : > { %838 = vpow2.f32 %v708_v30 }
 0x265   : > { %v839_v31 = vpop.eup %838 }
 0x266   : > { %v518_v32 = vadd.f32 1.0, %v839_v31 }
 0x268   : > { %840 = vrcp.f32 %v518_v32  ;;  %v530_v36 = vand.u32 2147483648, %v518_v32  ;;  %v528_v38 = vand.u32 2147483647, %v518_v32  ;;  %vm524_vm7 = vweird.f32 %v518_v32 }
 0x26a   : > { %v531_v40 = vor.u32 1.1754944e-38, %v530_v36  ;;  %vm529_vm9 = vcmp.eq.f32.partialorder %v528_v38, 8.507059e+37 }
 0x26e   : > { %v841_v33 = vpop.eup %840 }
 0x26f   : > { %v520_v34 = vmul.f32 %v841_v33, %v518_v32  ;;  %vm525_vm6 = vweird.f32 %v841_v33 }
 0x270   : > { %vm526_vm8 = vmor %vm524_vm7, %vm525_vm6 }
 0x271   : > { %v521_v35 = vsub.f32 1.0, %v520_v34 }
 0x273   : > { %v522_v37 = vmul.f32 %v841_v33, %v521_v35 }
 0x275   : > { %v523_v39 = vadd.f32 %v841_v33, %v522_v37 }
 0x277   : > { %v527_v41 = vsel %vm526_vm8, %v841_v33, %v523_v39 }
 0x278   : > { %v532_v42 = vsel %vm529_vm9, %v531_v40, %v527_v41 }
 0x279   : > { %v534_v43 = vadd.f32 1.0, %v532_v42 }
 0x27b   : > { %535 = vst.msk [vmem:[#allocation3] sm:$0xff] %vm453_vm3, %v534_v43 }
 0x27c PF: > { %p709_p13 = scmp.ne.s32.totalorder %s991_s8, 1 }
 0x27d   : > { %s540_s20 = sshra.s32 (!%p709_p13), %s698_s3, 7 }
 0x27e   : > { %539 = sbr.rel (%p709_p13) target bundleno = 763 (0x2fb), region = 68  ;;  %s710_s22 = sshll.u32 (!%p709_p13), %s540_s20, 2 }
 0x27f   : > { %s543_s19 = scalar_lea.vmem (!%p709_p13), [#allocation2], %s710_s22 }
 0x283   : > { %v546_v44 = vld [vmem:[#allocation3] sm:$0xff]  ;;  %v1015_v45 = vmov 0   ;;  %v544_v46 = vld [vmem:[%s543_s19] sm:$0xf] }
 0x284   : > { %842 = vset.pattern.permute.xlu0 %v1015_v45  ;;  %v545_v47 = vunpack.c.l.bf16 %v544_v46 }
 0x285   : > { %549 = vperm.xlu0 %842, %v546_v44  }
 0x2f7   : > { %v550_v48 = vpop.permute.xlu0 %549 }
 0x2f8   : > { %v552_v49 = vmul.f32 %v550_v48, %v545_v47 }
 0x2fa   : > { %553 = vst [vmem:[%s361_s5] sm:$0xff] %v552_v49 }
 0x2fb PF: > { %s562_s21 = smul.u32 %s987_s30, %s991_s8  ;;  %s712_s6 = sshll.u32 %s995_s9, 1 }
 0x2fc   : > { %s570_s17 = sshll.u32 %s361_s5, 4  ;;  %s1356_s27 = sld [smem:[#allocation22_spill]]  ;;  %s571_s17 = int_to_ptr.vmem [resolvable:$true] %s570_s17 }
 0x2fd   : > { %s566_s3 = sadd.s32 %s712_s6, %s562_s21  ;;  %s555_s19 = scalar_lea.sflag [#allocation6], %s359_s16 }
 0x2fe   : > { %s713_s23 = sshll.u32 %s566_s3, 3 }
 0x302   : > { %s1357_s20 = smov %s1356_s27  ;;  %s568_s10 = scalar_lea.hbm %s1356_s27, %s713_s23 }
 0x303   : > { %s572_s22 = sshll.u32 %s568_s10, 4  ;;  %s893_s9 = scalar_lea.hbm %s1357_s20, 32  ;;  %s573_s22 = int_to_ptr.hbm [resolvable:$true] %s572_s22 }
 0x304   : > { %s887_s0 = sshra.s32 %s573_s22, 4  ;;  %s888_s0 = int_to_ptr.hbm [resolvable:$true] %s887_s0 }
 0x305   : > { %s889_s1 = scalar_lea.hbm %s888_s0, 8  ;;  %p894_p5 = scmp.lt.s32.totalorder %s888_s0, %s1357_s20 }
 0x306   : > { %p890_p0 = scmp.ne.s32.totalorder %s888_s0, %s889_s1  ;;  %p895_p7 = scmp.lt.s32.totalorder %s893_s9, %s889_s1 }
 0x308   : > { %p891_p2 = pnand %p890_p0, %p1178_p1  ;;  %p896_p9 = por %p895_p7, %p894_p5 }
 0x30a   : > { %p892_p4 = pneg %p891_p2 }
 0x30c   : > { %p897_p6 = pnand %p896_p9, %p892_p4 }
 0x30e   : > { %900 = shalt.err (!%p897_p6)
}
 0x30f   : > { %718 = dma.vmem_to_hbm [thread:$0]  (%p1178_p1), %s571_s17, 128, %s573_s22, %s555_s19  }
 0x310 PF: > { %p729_p10 = scmp.ge.s32.totalorder %s1011_s13, 2  ;;  %s584_s16 = sand.u32 1, %s963_s24  }
 0x311   : > { %s585_s21 = scalar_lea.sflag [#allocation6], %s584_s16 }
 0x312   : > { %p725_p8 = pnand %p729_p10, %p1183_p3 }
 0x314   : > { %p726_p11 = pneg %p725_p8 }
 0x316   : > { %958 = dma.done.wait (%p726_p11), %s585_s21, 128  }
 0x317   : > { %960 = vsyncadd (%p726_p11), %s585_s21, 4294967168  ;;  %s23_s13 = sadd.s32 1, %s1011_s13   ;;  %s1359_s30 = sld [smem:[#allocation10_spill]] }
 0x318   : > { %p1271_p12 = scmp.ge.s32.totalorder %s23_s13, 10   ;;  %s1360_s8 = sld [smem:[#allocation11_spill]] }
 0x319   : > { %s1361_s10 = sld [smem:[#allocation12_spill]]  ;;  %s1364_s24 = smov %s967_s25 }
 0x31a   : > { %s1362_s1 = sld [smem:[#allocation13_spill]]  ;;  %s1365_s25 = smov %s971_s26 }
 0x31b   : > { %s1363_s14 = sld [smem:[#allocation14_spill]]  ;;  %s1366_s26 = smov %s1170_s11 }
 0x31c   : > { %s1367_s27 = smov %s979_s28  ;;  %s1368_s28 = smov %s983_s29 }
 0x31d   : > { %s1369_s29 = smov %s1167_s4  ;;  %s1370_s9 = smov %s1007_s12 }
 0x31e   :  { %22 = sbr.rel (!%p1271_p12) target bundleno = 19 (0x13), region = 114 }
 0x320   : > { %s1371_s11 = smov %s1362_s1 }
 0x321   : > { %s1372_s12 = smov %s1363_s14 }
 0x323   :  { %591 = vsyncpa [#allocation5], 1 }
 0x324   :  { %593 = vsyncpa [#allocation5 + $0x1], 1 }
 0x325   :  { %594 = vsyncpa [#allocation6], 1 }
 0x326   :  { %596 = vsyncpa [#allocation6 + $0x1], 1 }

</bundles_post_ra>
